<compile_context>
chip_gen: v7x
topology: tpu7x:2x2x1
jax: 0.10.0
libtpu: 0.0.40
codegen_flags: <defaults>
</compile_context>

<pallas_src>
import functools

import jax
import jax.numpy as jnp
from jax.experimental import pallas as pl
from jax.experimental.pallas import tpu as pltpu


def _round_up(x, m):
    return (x + m - 1) // m * m


# ---------------------------------------------------------------------------
# Pallas kernels
# ---------------------------------------------------------------------------
def _gat_layer_kernel(blk_lo_ref, blk_hi_ref,                  # scalar prefetch (SMEM)
                      feat_ref, dst_ref, a_ref, emul_ref, hmask_ref,
                      out_ref, acc_ref, *, alpha, apply_elu, w_out, num_heads):
    n = pl.program_id(0)          # node-tile index ("parallel")
    e = pl.program_id(1)          # local edge-block index ("arbitrary" reduction)

    @pl.when(e == 0)
    def _zero():
        acc_ref[...] = jnp.zeros_like(acc_ref)

    # Number of dst-sorted edge blocks that can touch this node tile.
    n_blocks = blk_hi_ref[n] - blk_lo_ref[n]

    @pl.when(e < n_blocks)
    def _accumulate():
        feat = feat_ref[...]                                                  # [Et, Kp] bf16
        # One fused long-K MXU matmul -> [per-head features | rowsum ones | logits].
        m = jnp.dot(feat, a_ref[...], preferred_element_type=jnp.float32)     # [Et, Wc] f32
        p = m[:, w_out + num_heads:w_out + 2 * num_heads]                     # [Et, H] logits
        powers = -jnp.where(p > 0, p, alpha * p)                              # -LeakyReLU
        edge_e = jnp.exp(powers)                                              # [Et, H]
        # TODO(synk): nn.Dropout on edge_e is identity in eval mode; training dropout not implemented.

        # Broadcast each head's edge_e over its feature columns and its rowsum
        # column (pure VPU); logit / padding columns get 0.
        ee = edge_e[:, 0:1] * emul_ref[0:1, :]
        for h in range(1, num_heads):
            ee = ee + edge_e[:, h:h + 1] * emul_ref[h:h + 1, :]
        comb = (m * ee).astype(jnp.bfloat16)                                  # [Et, Wc]

        # Blocked one-hot scatter-add onto the node rows of this tile (MXU).
        n_tile = acc_ref.shape[0]
        e_tile = feat_ref.shape[0]
        rows = jax.lax.broadcasted_iota(jnp.int32, (n_tile, e_tile), 0) + n * n_tile
        onehot = (rows == dst_ref[...]).astype(jnp.bfloat16)                  # [Nt, Et] (0/1 exact)
        acc_ref[...] += jnp.dot(onehot, comb, preferred_element_type=jnp.float32)

    @pl.when(e == pl.num_programs(1) - 1)
    def _finalize():
        acc = acc_ref[...]                                                    # [Nt, Wc]
        rs = acc[:, w_out:w_out + num_heads]                                  # per-head rowsums
        rs = jnp.where(rs == 0.0, 1e-12, rs)                                  # matches reference
        inv = 1.0 / rs                                                        # exact divide
        inv_w = inv[:, 0:1] * hmask_ref[0:1, :]
        for h in range(1, num_heads):
            inv_w = inv_w + inv[:, h:h + 1] * hmask_ref[h:h + 1, :]
        hout = acc * inv_w                                                    # non-feature cols -> 0
        if apply_elu:
            hout = jnp.where(hout > 0, hout, jnp.exp(hout) - 1.0)             # ELU
        out_ref[...] = hout


def _matmul_kernel(x_ref, w_ref, o_ref):
    o_ref[...] = jnp.dot(x_ref[...], w_ref[...], preferred_element_type=jnp.float32)


# ---------------------------------------------------------------------------
# Wrappers
# ---------------------------------------------------------------------------
def pallas_matmul(x, w, tm=256):
    """relation_embed @ W, M-tiled so large relation tables still pipeline."""
    m, k = x.shape
    _, n = w.shape
    tm = min(tm, _round_up(m, 8))
    m_pad = _round_up(m, tm)
    x_p = jnp.pad(x.astype(jnp.float32), ((0, m_pad - m), (0, 0)))
    out = pl.pallas_call(
        _matmul_kernel,
        out_shape=jax.ShapeDtypeStruct((m_pad, n), jnp.float32),
        grid=(m_pad // tm,),
        in_specs=[pl.BlockSpec((tm, k), lambda i: (i, 0)),
                  pl.BlockSpec((k, n), lambda i: (0, 0))],
        out_specs=pl.BlockSpec((tm, n), lambda i: (i, 0)),
        compiler_params=pltpu.CompilerParams(dimension_semantics=("parallel",)),
    )(x_p, w.astype(jnp.float32))
    return out[:m]


def sp_graph_attention_layer(x, edge, edge_embed, edge_nhop, edge_embed_nhop,
                             a_list, a2_list, *, alpha, apply_elu,
                             n_tile=256, e_tile=1024):
    """All heads of one SpGraphAttentionLayer in a single tiled kernel (eval mode)."""
    edge_all = jnp.concatenate([edge, edge_nhop], axis=1)           # [2, E]
    eemb = jnp.concatenate([edge_embed, edge_embed_nhop], axis=0)   # [E, Drel]

    N, Din = x.shape
    Drel = eemb.shape[1]
    E = edge_all.shape[1]
    H = len(a_list)
    Dout = a_list[0].shape[0]
    W_out = H * Dout
    W_comb = _round_up(W_out + 2 * H, 128)      # features | rowsum | logits | pad (lane-dense)
    K = 2 * Din + Drel
    K_pad = _round_up(K + 1, 128)               # +1 for the constant "ones" column
    ones_col = K

    # Per-edge features gathered once for all heads (built directly in glue).
    # TODO(synk): when N*Din fits VMEM, gather h_i/h_j in-kernel from a resident x to cut
    # feat HBM traffic by ~2*Din/K; here we at least stream feat as bf16.
    feat = jnp.concatenate([x[edge_all[0]], x[edge_all[1]], eemb], axis=1).astype(jnp.float32)
    dst = edge_all[0].astype(jnp.int32)

    # Sort edges by destination so each node tile sees a contiguous edge-block range.
    order = jnp.argsort(dst)
    feat = feat[order]
    dst = dst[order]

    # Tile sizes / padding (sublane- and lane-aligned).
    Nt = min(n_tile, _round_up(N, 8))
    Et = min(e_tile, _round_up(E, 128))
    N_pad = _round_up(N, Nt)
    E_pad = _round_up(E, Et)
    num_nb = N_pad // Nt
    num_eb = E_pad // Et

    feat = jnp.pad(feat, ((0, E_pad - E), (0, K_pad - K)))
    feat = feat.at[:, ones_col].set(1.0)                        # rowsum "ones" column
    feat = feat.astype(jnp.bfloat16)
    dst = jnp.pad(dst, (0, E_pad - E), constant_values=N_pad)   # sentinel: never matches a row
    dst2d = dst[None, :]

    # Per-node-tile [first, last) edge-block range (scalar-prefetched to SMEM).
    tile_starts = jnp.arange(num_nb, dtype=jnp.int32) * Nt
    lo_e = jnp.searchsorted(dst, tile_starts).astype(jnp.int32)
    hi_e = jnp.searchsorted(dst, tile_starts + Nt).astype(jnp.int32)
    blk_lo = (lo_e // Et).astype(jnp.int32)
    blk_hi = jnp.where(hi_e > lo_e, (hi_e + Et - 1) // Et, blk_lo).astype(jnp.int32)
    # Static grid extent = worst-case blocks per tile (host sync; wrapper not jitted).
    max_blk = max(int(jnp.max(blk_hi - blk_lo)), 1)

    # Fused parameter matrix: [stacked a^T | rowsum-ones row | stacked a^T a2^T | 0-pad].
    a_feat = jnp.concatenate([a.T for a in a_list], axis=1).astype(jnp.float32)            # [K, W_out]
    a_logit = jnp.concatenate([a.T @ a2.T for a, a2 in zip(a_list, a2_list)], axis=1)      # [K, H]
    a_comb = jnp.zeros((K_pad, W_comb), jnp.float32)
    a_comb = a_comb.at[:K, :W_out].set(a_feat)
    a_comb = a_comb.at[:K, W_out + H:W_out + 2 * H].set(a_logit.astype(jnp.float32))
    a_comb = a_comb.at[ones_col, W_out:W_out + H].set(1.0)
    a_comb = a_comb.astype(jnp.bfloat16)

    # Broadcast / normalization masks.
    cols = jnp.arange(W_comb)
    hids = jnp.arange(H)
    head_cols = ((cols[None, :] // Dout) == hids[:, None]) & (cols[None, :] < W_out)   # [H, Wc]
    rowsum_cols = cols[None, :] == (W_out + hids[:, None])                              # [H, Wc]
    emul = (head_cols | rowsum_cols).astype(jnp.float32)
    hmask = head_cols.astype(jnp.float32)

    kernel = functools.partial(_gat_layer_kernel, alpha=alpha, apply_elu=apply_elu,
                               w_out=W_out, num_heads=H)

    def _feat_map(n, e, lo, hi):
        return (jnp.minimum(lo[n] + e, num_eb - 1), 0)

    def _dst_map(n, e, lo, hi):
        return (0, jnp.minimum(lo[n] + e, num_eb - 1))

    def _const_map(n, e, lo, hi):
        return (0, 0)

    def _out_map(n, e, lo, hi):
        return (n, 0)

    grid_spec = pltpu.PrefetchScalarGridSpec(
        num_scalar_prefetch=2,
        grid=(num_nb, max_blk),
        in_specs=[
            pl.BlockSpec((Et, K_pad), _feat_map),        # feat (bf16, streamed per-tile range)
            pl.BlockSpec((1, Et), _dst_map),             # dst  (edge tiles)
            pl.BlockSpec((K_pad, W_comb), _const_map),   # fused [a^T | ones | a^T a2^T]
            pl.BlockSpec((H, W_comb), _const_map),       # edge_e broadcast mask
            pl.BlockSpec((H, W_comb), _const_map),       # head feature-region mask
        ],
        out_specs=pl.BlockSpec((Nt, W_comb), _out_map),
        scratch_shapes=[pltpu.VMEM((Nt, W_comb), jnp.float32)],
    )
    out = pl.pallas_call(
        kernel,
        out_shape=jax.ShapeDtypeStruct((N_pad, W_comb), jnp.float32),
        grid_spec=grid_spec,
        compiler_params=pltpu.CompilerParams(
            dimension_semantics=("parallel", "arbitrary"),
            # <= ~48 MiB so the same config also fits v7x's 64 MiB/TC VMEM;
            # bump toward 64 MiB (and Et to 2048) on v5e/v6e if desired.
            vmem_limit_bytes=48 * 1024 * 1024),
    )(blk_lo, blk_hi, feat, dst2d, a_comb, emul, hmask)
    return out[:N, :W_out]


# ---------------------------------------------------------------------------
# SpGAT parameters + forward
# ---------------------------------------------------------------------------
def _xavier(key, shape, gain=1.414):
    fan_out, fan_in = shape[0], shape[1]
    std = gain * (2.0 / (fan_in + fan_out)) ** 0.5
    return std * jax.random.normal(key, shape, dtype=jnp.float32)


def init_spgat_params(key, num_nodes, nfeat, relation_dim, nheads):
    keys = jax.random.split(key, 2 * nheads + 3)
    attn = []
    for h in range(nheads):
        a = _xavier(keys[2 * h], (nfeat, 2 * nfeat + relation_dim))   # [out, 2*in + rel]
        a2 = _xavier(keys[2 * h + 1], (1, nfeat))                     # [1, out]
        attn.append((a, a2))
    W = _xavier(keys[2 * nheads], (relation_dim, nheads * nfeat))
    d = nheads * nfeat
    out_a = _xavier(keys[2 * nheads + 1], (d, 2 * d + d))
    out_a2 = _xavier(keys[2 * nheads + 2], (1, d))
    return {"attn": attn, "W": W, "out_a": out_a, "out_a2": out_a2}


def spgat_forward(params, entity_embeddings, relation_embed,
                  edge_list, edge_type, edge_embed,
                  edge_list_nhop, edge_type_nhop, *, alpha):
    x = entity_embeddings
    edge_embed_nhop = (relation_embed[edge_type_nhop[:, 0]]
                       + relation_embed[edge_type_nhop[:, 1]])

    # All multi-head attention layers fused into ONE kernel call (concat=True -> ELU inside).
    a_list = [a for a, _ in params["attn"]]
    a2_list = [a2 for _, a2 in params["attn"]]
    x = sp_graph_attention_layer(x, edge_list, edge_embed, edge_list_nhop,
                                 edge_embed_nhop, a_list, a2_list,
                                 alpha=alpha, apply_elu=True)
    # self.dropout_layer(x): identity in eval mode.

    out_relation_1 = pallas_matmul(relation_embed, params["W"])
    edge_embed_1 = out_relation_1[edge_type]
    edge_embed_nhop_1 = (out_relation_1[edge_type_nhop[:, 0]]
                         + out_relation_1[edge_type_nhop[:, 1]])

    # out_att has concat=False (no internal ELU); SpGAT applies F.elu outside,
    # fused here as apply_elu=True.
    x = sp_graph_attention_layer(x, edge_list, edge_embed_1, edge_list_nhop,
                                 edge_embed_nhop_1, [params["out_a"]],
                                 [params["out_a2"]], alpha=alpha, apply_elu=True)
    return x, out_relation_1


# ---------------------------------------------------------------------------
if __name__ == "__main__":
    num_nodes, nfeat, relation_dim, nheads = 16, 32, 32, 2
    num_relations, E1, E2 = 8, 24, 8
    alpha = 0.2  # LeakyReLU slope; dropout=0.3 unused in eval mode

    key = jax.random.PRNGKey(0)
    kp, ke, kr, k1, k2, k3, k4 = jax.random.split(key, 7)
    params = init_spgat_params(kp, num_nodes, nfeat, relation_dim, nheads)

    entity_embeddings = jax.random.normal(ke, (num_nodes, nfeat), dtype=jnp.float32)
    relation_embed = jax.random.normal(kr, (num_relations, relation_dim), dtype=jnp.float32)
    edge_list = jax.random.randint(k1, (2, E1), 0, num_nodes, dtype=jnp.int32)
    edge_type = jax.random.randint(k2, (E1,), 0, num_relations, dtype=jnp.int32)
    edge_embed = relation_embed[edge_type]
    edge_list_nhop = jax.random.randint(k3, (2, E2), 0, num_nodes, dtype=jnp.int32)
    edge_type_nhop = jax.random.randint(k4, (E2, 2), 0, num_relations, dtype=jnp.int32)

    x_out, out_rel = spgat_forward(params, entity_embeddings, relation_embed,
                                   edge_list, edge_type, edge_embed,
                                   edge_list_nhop, edge_type_nhop, alpha=alpha)
    jax.block_until_ready((x_out, out_rel))

    assert x_out.shape == (num_nodes, nheads * nfeat)
    assert out_rel.shape == (num_relations, nheads * nfeat)
    assert bool(jnp.all(jnp.isfinite(x_out))) and bool(jnp.all(jnp.isfinite(out_rel)))
    print("KERNEL_OK")
</pallas_src>

<mosaic_0001>
module attributes {stable_mosaic.version = 11 : i64} {
  func.func @_gat_layer_kernel(%arg0: i32, %arg1: i32, %arg2: memref<1xi32, #tpu.memory_space<smem>>, %arg3: memref<1xi32, #tpu.memory_space<smem>>, %arg4: memref<128x128xbf16, #tpu.memory_space<vmem>>, %arg5: memref<1x128xi32, #tpu.memory_space<vmem>>, %arg6: memref<128x128xbf16, #tpu.memory_space<vmem>>, %arg7: memref<2x128xf32, #tpu.memory_space<vmem>>, %arg8: memref<2x128xf32, #tpu.memory_space<vmem>>, %arg9: memref<16x128xf32, #tpu.memory_space<vmem>>, %arg10: memref<16x128xf32, #tpu.memory_space<vmem>>) attributes {dimension_semantics = [#tpu.dimension_semantics<parallel>, #tpu.dimension_semantics<arbitrary>], iteration_bounds = array<i64: 1, 1>, scalar_prefetch = 2 : i64, scratch_operands = 1 : i64, tpu.core_type = #tpu.core_type<tc>, window_params = [{transform_indices = @transform_0, window_bounds = array<i64: 128, 128>}, {transform_indices = @transform_1, window_bounds = array<i64: 1, 128>}, {pipeline_mode = #tpu.pipeline_mode<synchronous>, transform_indices = @transform_2, window_bounds = array<i64: 128, 128>}, {pipeline_mode = #tpu.pipeline_mode<synchronous>, transform_indices = @transform_3, window_bounds = array<i64: 2, 128>}, {pipeline_mode = #tpu.pipeline_mode<synchronous>, transform_indices = @transform_4, window_bounds = array<i64: 2, 128>}, {transform_indices = @transform_5, window_bounds = array<i64: 16, 128>}]} {
    %c0_i32 = arith.constant 0 : i32
    %0 = arith.cmpi eq, %arg1, %c0_i32 : i32
    %1 = arith.extui %0 : i1 to i32
    %c0_i32_0 = arith.constant 0 : i32
    %2 = arith.cmpi ne, %1, %c0_i32_0 : i32
    scf.if %2 {
      %cst = arith.constant 0.000000e+00 : f32
      %14 = vector.broadcast %cst : f32 to vector<16x128xf32>
      %c0 = arith.constant 0 : index
      %c0_4 = arith.constant 0 : index
      %15 = vector.load %arg10[%c0, %c0_4] : memref<16x128xf32, #tpu.memory_space<vmem>>, vector<16x128xf32>
      tpu.vector_store %arg10[%c0, %c0_4], %14 {strides = array<i32>} : memref<16x128xf32, #tpu.memory_space<vmem>>, vector<16x128xf32>,
    } else {
    }
    %3 = arith.index_cast %arg0 : i32 to index
    %4 = memref.load %arg3[%3] : memref<1xi32, #tpu.memory_space<smem>>
    %5 = arith.index_cast %arg0 : i32 to index
    %6 = memref.load %arg2[%5] : memref<1xi32, #tpu.memory_space<smem>>
    %7 = arith.subi %4, %6 : i32
    %8 = arith.cmpi slt, %arg1, %7 : i32
    %9 = arith.extui %8 : i1 to i32
    %c0_i32_1 = arith.constant 0 : i32
    %10 = arith.cmpi ne, %9, %c0_i32_1 : i32
    scf.if %10 {
      %c0 = arith.constant 0 : index
      %c0_4 = arith.constant 0 : index
      %14 = vector.load %arg4[%c0, %c0_4] : memref<128x128xbf16, #tpu.memory_space<vmem>>, vector<128x128xbf16>
      %c0_5 = arith.constant 0 : index
      %c0_6 = arith.constant 0 : index
      %15 = vector.load %arg6[%c0_5, %c0_6] : memref<128x128xbf16, #tpu.memory_space<vmem>>, vector<128x128xbf16>
      %cst = arith.constant dense<0.000000e+00> : vector<128x128xf32>
      %16 = tpu.matmul %14, %15, %cst {dimension_numbers = #tpu.dot_dimension_numbers<[1], [0], [0], [1], [0, 0, 1, 1], [], []>} : vector<128x128xbf16>, vector<128x128xbf16>, vector<128x128xf32> -> vector<128x128xf32>
      %17 = vector.extract_strided_slice %16 {offsets = [0, 66], sizes = [128, 2], strides = [1, 1]} : vector<128x128xf32> to vector<128x2xf32>
      %cst_7 = arith.constant 0.000000e+00 : f32
      %18 = vector.broadcast %cst_7 : f32 to vector<128x2xf32>
      %19 = arith.cmpf ogt, %17, %18 : vector<128x2xf32>
      %cst_8 = arith.constant 2.000000e-01 : f32
      %20 = vector.broadcast %cst_8 : f32 to vector<128x2xf32>
      %21 = arith.mulf %20, %17 : vector<128x2xf32>
      %22 = arith.select %19, %17, %21 : vector<128x2xi1>, vector<128x2xf32>
      %cst_9 = arith.constant 0.000000e+00 : f32
      %23 = vector.broadcast %cst_9 : f32 to vector<128x2xf32>
      %24 = arith.subf %23, %22 : vector<128x2xf32>
      %25 = math.exp %24 : vector<128x2xf32>
      %26 = vector.extract_strided_slice %25 {offsets = [0, 0], sizes = [128, 1], strides = [1, 1]} : vector<128x2xf32> to vector<128x1xf32>
      %c0_10 = arith.constant 0 : index
      %c0_11 = arith.constant 0 : index
      %27 = vector.load %arg7[%c0_10, %c0_11] : memref<2x128xf32, #tpu.memory_space<vmem>>, vector<1x128xf32>
      %28 = vector.broadcast %26 : vector<128x1xf32> to vector<128x128xf32>
      %29 = vector.broadcast %27 : vector<1x128xf32> to vector<128x128xf32>
      %30 = arith.mulf %28, %29 : vector<128x128xf32>
      %31 = vector.extract_strided_slice %25 {offsets = [0, 1], sizes = [128, 1], strides = [1, 1]} : vector<128x2xf32> to vector<128x1xf32>
      %c1 = arith.constant 1 : index
      %c0_12 = arith.constant 0 : index
      %32 = vector.load %arg7[%c1, %c0_12] : memref<2x128xf32, #tpu.memory_space<vmem>>, vector<1x128xf32>
      %33 = vector.broadcast %31 : vector<128x1xf32> to vector<128x128xf32>
      %34 = vector.broadcast %32 : vector<1x128xf32> to vector<128x128xf32>
      %35 = arith.mulf %33, %34 : vector<128x128xf32>
      %36 = arith.addf %30, %35 : vector<128x128xf32>
      %37 = arith.mulf %16, %36 : vector<128x128xf32>
      %38 = arith.truncf %37 : vector<128x128xf32> to vector<128x128xbf16>
      %39 = tpu.iota {dimensions = array<i32: 0>} : vector<16x128xi32>
      %c16_i32 = arith.constant 16 : i32
      %40 = arith.muli %arg0, %c16_i32 : i32
      %41 = vector.broadcast %40 : i32 to vector<16x128xi32>
      %42 = arith.addi %39, %41 : vector<16x128xi32>
      %c0_13 = arith.constant 0 : index
      %c0_14 = arith.constant 0 : index
      %43 = vector.load %arg5[%c0_13, %c0_14] : memref<1x128xi32, #tpu.memory_space<vmem>>, vector<1x128xi32>
      %44 = vector.broadcast %43 : vector<1x128xi32> to vector<16x128xi32>
      %45 = arith.cmpi eq, %42, %44 : vector<16x128xi32>
      %46 = arith.extui %45 : vector<16x128xi1> to vector<16x128xi32>
      %47 = arith.sitofp %46 : vector<16x128xi32> to vector<16x128xf32>
      %48 = arith.truncf %47 : vector<16x128xf32> to vector<16x128xbf16>
      %c0_15 = arith.constant 0 : index
      %c0_16 = arith.constant 0 : index
      %49 = vector.load %arg10[%c0_15, %c0_16] : memref<16x128xf32, #tpu.memory_space<vmem>>, vector<16x128xf32>
      %cst_17 = arith.constant dense<0.000000e+00> : vector<16x128xf32>
      %50 = tpu.matmul %48, %38, %cst_17 {dimension_numbers = #tpu.dot_dimension_numbers<[1], [0], [0], [1], [0, 0, 1, 1], [], []>} : vector<16x128xbf16>, vector<128x128xbf16>, vector<16x128xf32> -> vector<16x128xf32>
      %51 = arith.addf %49, %50 : vector<16x128xf32>
      %c0_18 = arith.constant 0 : index
      %c0_19 = arith.constant 0 : index
      %52 = vector.load %arg10[%c0_18, %c0_19] : memref<16x128xf32, #tpu.memory_space<vmem>>, vector<16x128xf32>
      tpu.vector_store %arg10[%c0_18, %c0_19], %51 {strides = array<i32>} : memref<16x128xf32, #tpu.memory_space<vmem>>, vector<16x128xf32>,
    } else {
    }
    %c0_i32_2 = arith.constant 0 : i32
    %11 = arith.cmpi eq, %arg1, %c0_i32_2 : i32
    %12 = arith.extui %11 : i1 to i32
    %c0_i32_3 = arith.constant 0 : i32
    %13 = arith.cmpi ne, %12, %c0_i32_3 : i32
    scf.if %13 {
      %c0 = arith.constant 0 : index
      %c0_4 = arith.constant 0 : index
      %14 = vector.load %arg10[%c0, %c0_4] : memref<16x128xf32, #tpu.memory_space<vmem>>, vector<16x128xf32>
      %15 = vector.extract_strided_slice %14 {offsets = [0, 64], sizes = [16, 2], strides = [1, 1]} : vector<16x128xf32> to vector<16x2xf32>
      %cst = arith.constant 0.000000e+00 : f32
      %16 = vector.broadcast %cst : f32 to vector<16x2xf32>
      %17 = arith.cmpf oeq, %15, %16 : vector<16x2xf32>
      %cst_5 = arith.constant 9.99999996E-13 : f32
      %18 = vector.broadcast %cst_5 : f32 to vector<16x2xf32>
      %19 = arith.select %17, %18, %15 : vector<16x2xi1>, vector<16x2xf32>
      %cst_6 = arith.constant 1.000000e+00 : f32
      %20 = vector.broadcast %cst_6 : f32 to vector<16x2xf32>
      %21 = arith.divf %20, %19 : vector<16x2xf32>
      %22 = vector.extract_strided_slice %21 {offsets = [0, 0], sizes = [16, 1], strides = [1, 1]} : vector<16x2xf32> to vector<16x1xf32>
      %c0_7 = arith.constant 0 : index
      %c0_8 = arith.constant 0 : index
      %23 = vector.load %arg8[%c0_7, %c0_8] : memref<2x128xf32, #tpu.memory_space<vmem>>, vector<1x128xf32>
      %24 = vector.broadcast %22 : vector<16x1xf32> to vector<16x128xf32>
      %25 = vector.broadcast %23 : vector<1x128xf32> to vector<16x128xf32>
      %26 = arith.mulf %24, %25 : vector<16x128xf32>
      %27 = vector.extract_strided_slice %21 {offsets = [0, 1], sizes = [16, 1], strides = [1, 1]} : vector<16x2xf32> to vector<16x1xf32>
      %c1 = arith.constant 1 : index
      %c0_9 = arith.constant 0 : index
      %28 = vector.load %arg8[%c1, %c0_9] : memref<2x128xf32, #tpu.memory_space<vmem>>, vector<1x128xf32>
      %29 = vector.broadcast %27 : vector<16x1xf32> to vector<16x128xf32>
      %30 = vector.broadcast %28 : vector<1x128xf32> to vector<16x128xf32>
      %31 = arith.mulf %29, %30 : vector<16x128xf32>
      %32 = arith.addf %26, %31 : vector<16x128xf32>
      %33 = arith.mulf %14, %32 : vector<16x128xf32>
      %cst_10 = arith.constant 0.000000e+00 : f32
      %34 = vector.broadcast %cst_10 : f32 to vector<16x128xf32>
      %35 = arith.cmpf ogt, %33, %34 : vector<16x128xf32>
      %36 = math.exp %33 : vector<16x128xf32>
      %cst_11 = arith.constant 1.000000e+00 : f32
      %37 = vector.broadcast %cst_11 : f32 to vector<16x128xf32>
      %38 = arith.subf %36, %37 : vector<16x128xf32>
      %39 = arith.select %35, %33, %38 : vector<16x128xi1>, vector<16x128xf32>
      %c0_12 = arith.constant 0 : index
      %c0_13 = arith.constant 0 : index
      %40 = vector.load %arg9[%c0_12, %c0_13] : memref<16x128xf32, #tpu.memory_space<vmem>>, vector<16x128xf32>
      tpu.vector_store %arg9[%c0_12, %c0_13], %39 {strides = array<i32>} : memref<16x128xf32, #tpu.memory_space<vmem>>, vector<16x128xf32>,
    } else {
    }
    return
  }
  func.func @transform_0(%arg0: i32, %arg1: i32, %arg2: memref<1xi32, #tpu.memory_space<smem>>, %arg3: memref<1xi32, #tpu.memory_space<smem>>) -> (i32, i32) {
    %0 = arith.index_cast %arg0 : i32 to index
    %1 = memref.load %arg2[%0] : memref<1xi32, #tpu.memory_space<smem>>
    %2 = arith.addi %1, %arg1 : i32
    %c0_i32 = arith.constant 0 : i32
    %3 = arith.minsi %2, %c0_i32 : i32
    %c0_i32_0 = arith.constant 0 : i32
    %c0_i32_1 = arith.constant 0 : i32
    return %3, %c0_i32_0 : i32, i32
  }
  func.func @transform_1(%arg0: i32, %arg1: i32, %arg2: memref<1xi32, #tpu.memory_space<smem>>, %arg3: memref<1xi32, #tpu.memory_space<smem>>) -> (i32, i32) {
    %0 = arith.index_cast %arg0 : i32 to index
    %1 = memref.load %arg2[%0] : memref<1xi32, #tpu.memory_space<smem>>
    %2 = arith.addi %1, %arg1 : i32
    %c0_i32 = arith.constant 0 : i32
    %3 = arith.minsi %2, %c0_i32 : i32
    %c0_i32_0 = arith.constant 0 : i32
    %c0_i32_1 = arith.constant 0 : i32
    return %c0_i32_0, %3 : i32, i32
  }
  func.func @transform_2(%arg0: i32, %arg1: i32, %arg2: memref<1xi32, #tpu.memory_space<smem>>, %arg3: memref<1xi32, #tpu.memory_space<smem>>) -> (i32, i32) {
    %c0_i32 = arith.constant 0 : i32
    %c0_i32_0 = arith.constant 0 : i32
    %c0_i32_1 = arith.constant 0 : i32
    return %c0_i32, %c0_i32_0 : i32, i32
  }
  func.func @transform_3(%arg0: i32, %arg1: i32, %arg2: memref<1xi32, #tpu.memory_space<smem>>, %arg3: memref<1xi32, #tpu.memory_space<smem>>) -> (i32, i32) {
    %c0_i32 = arith.constant 0 : i32
    %c0_i32_0 = arith.constant 0 : i32
    %c0_i32_1 = arith.constant 0 : i32
    return %c0_i32, %c0_i32_0 : i32, i32
  }
  func.func @transform_4(%arg0: i32, %arg1: i32, %arg2: memref<1xi32, #tpu.memory_space<smem>>, %arg3: memref<1xi32, #tpu.memory_space<smem>>) -> (i32, i32) {
    %c0_i32 = arith.constant 0 : i32
    %c0_i32_0 = arith.constant 0 : i32
    %c0_i32_1 = arith.constant 0 : i32
    return %c0_i32, %c0_i32_0 : i32, i32
  }
  func.func @transform_5(%arg0: i32, %arg1: i32, %arg2: memref<1xi32, #tpu.memory_space<smem>>, %arg3: memref<1xi32, #tpu.memory_space<smem>>) -> (i32, i32) {
    %c0_i32 = arith.constant 0 : i32
    %c0_i32_0 = arith.constant 0 : i32
    return %arg0, %c0_i32 : i32, i32
  }
}

</mosaic_0001>

<bundles_post_ra>
// kernel: tpu_custom_call.1
= control target key start
LH: loop header
LB: loop body
LE: loop exit
PB: predicated region body
PF: predicated region fallthrough
CT: control target
= control target key end

     0   :  { %14 = vsyncpa [#allocation7], 0  ;;  %s1387_s0 = inlined_call_operand.<no memory space> [shape: s32[1], index: 0, kind: input, shape index: {}]   ;;  %s1388_s1 = inlined_call_operand.<no memory space> [shape: s32[1], index: 1, kind: input, shape index: {}]   ;;  %s1389_s2 = inlined_call_operand.hbm [shape: bf16[128,128], index: 2, kind: input, shape index: {}]   ;;  %s1390_s3 = inlined_call_operand.vmem [shape: s32[1,128], index: 3, kind: input, shape index: {}]   ;;  %s1391_s4 = inlined_call_operand.hbm [shape: bf16[128,128], index: 4, kind: input, shape index: {}]   ;;  %s1392_s5 = inlined_call_operand.vmem [shape: f32[2,128], index: 5, kind: input, shape index: {}]   ;;  %s1393_s6 = inlined_call_operand.vmem [shape: f32[2,128], index: 6, kind: input, shape index: {}]   ;;  %s1394_s7 = inlined_call_operand.hbm [shape: f32[16,128], index: 7, kind: output, shape index: {}]  }
   0x1   :  { %15 = vsyncpa [#allocation10], 0 }
   0x2   :  { %16 = vsyncpa [#allocation8], 0  ;;  %p21_p0 = scmp.lt.s32.totalorder %s1387_s0, 0  ;;  %s1088_s26 = smov [#allocation6]  }
   0x3   :  { %s29_s27 = sshll.u32 %s1088_s26, 4  ;;  %s1089_s14 = smov [#allocation9]   ;;  %s30_s27 = int_to_ptr.vmem [resolvable:$true] %s29_s27 }
   0x4   :  { %s1153_s9 = scalar_select %p21_p0, %s1387_s0, 0 }
   0x5   :  { %s54_s15 = sshll.u32 %s1089_s14, 4  ;;  %s1016_s19 = scalar_lea.hbm %s1389_s2, 1024  ;;  %s55_s15 = int_to_ptr.vmem [resolvable:$true] %s54_s15 }
   0x6   :  { %s839_s10 = sshll.u32 %s1153_s9, 10 }
   0x7   :  { %s28_s13 = scalar_lea.hbm %s1389_s2, %s839_s10 }
   0x8   :  { %s1014_s16 = scalar_lea.hbm %s28_s13, 1024  ;;  %p1017_p2 = scmp.lt.u32.totalorder %s28_s13, %s1389_s2 }
   0x9   :  { %p1015_p1 = scmp.ne.s32.totalorder %s28_s13, %s1014_s16  ;;  %p1018_p3 = scmp.lt.u32.totalorder %s1016_s19, %s1014_s16 }
   0xa   :  { %p1020_p5 = scmp.lt.u32.totalorder %s1014_s16, %s28_s13 }
   0xb   :  { %p1019_p4 = por %p1018_p3, %p1017_p2 }
   0xd   :  { %p1021_p6 = por %p1020_p5, %p1019_p4 }
   0xf   :  { %p1022_p7 = pnand %p1021_p6, %p1015_p1 }
  0x11   :  { %1025 = shalt.err (!%p1022_p7)
}
  0x12   :  { %s1026_s22 = scalar_lea.vmem %s30_s27, 1024  ;;  %p1031_p9 = scmp.lt.s32.totalorder %s30_s27, %s30_s27 }
  0x13   :  { %p1027_p8 = scmp.ne.s32.totalorder %s30_s27, %s1026_s22  ;;  %p1032_p10 = scmp.lt.s32.totalorder %s1026_s22, %s1026_s22 }
  0x15   :  { %p1033_p11 = por %p1032_p10, %p1031_p9 }
  0x17   :  { %p1034_p12 = pnand %p1033_p11, %p1027_p8 }
  0x19   :  { %1037 = shalt.err (!%p1034_p12)
}
  0x1a   :  { %s1090_s23 = smov 64   ;;  %s1091_s24 = smov 4  }
  0x1b   :  { %35 = dma.hbm_to_vmem [thread:$0]  %s28_s13, 1024, %s30_s27, [#allocation7], %s1090_s23, %s1090_s23, %s1091_s24  }
  0x1c   :  { %s1038_s2 = scalar_lea.hbm %s1391_s4, 1024 }
  0x1d   :  { %p1039_p13 = scmp.ne.s32.totalorder %s1391_s4, %s1038_s2  ;;  %p1042_p1 = scmp.lt.u32.totalorder %s1038_s2, %s1391_s4 }
  0x1f   :  { %p1044_p2 = pnand %p1042_p1, %p1039_p13 }
  0x21   :  { %1047 = shalt.err (!%p1044_p2)
}
  0x22   :  { %s1048_s10 = scalar_lea.vmem %s55_s15, 1024  ;;  %p1053_p4 = scmp.lt.s32.totalorder %s55_s15, %s55_s15 }
  0x23   :  { %p1049_p3 = scmp.ne.s32.totalorder %s55_s15, %s1048_s10  ;;  %p1054_p5 = scmp.lt.s32.totalorder %s1048_s10, %s1048_s10 }
  0x25   :  { %p1055_p6 = por %p1054_p5, %p1053_p4 }
  0x27   :  { %p1056_p7 = pnand %p1055_p6, %p1049_p3 }
  0x29   :  { %1059 = shalt.err (!%p1056_p7)
}
  0x2a   :  { %60 = dma.hbm_to_vmem [thread:$0]  %s1391_s4, 1024, %s55_s15, [#allocation10], %s1090_s23, %s1090_s23, %s1091_s24  }
  0x2b   :  { %1082 = dma.done.wait [#allocation7], 1024  }
  0x2c   :  { %1083 = vsyncadd [#allocation7], 4294966272 }
  0x2d   :  { %1084 = dma.done.wait [#allocation10], 1024  }
  0x2e   :  { %1085 = vsyncadd [#allocation10], 4294966272  ;;  %s1396_s9 = smov (!%p21_p0, %s1153_s9), 0  ;;  %v1092_v0 = vmov 0.0   ;;  %s103_s15 = ssub.s32 %s1388_s1, %s1387_s0 }
  0x2f   :  { %99 = vst [vmem:[#allocation2] sm:$0xff] %v1092_v0  ;;  %100 = vst [vmem:[#allocation2 + $0x8] sm:$0xff] %v1092_v0  ;;  %s89_s20 = scalar_lea.vmem %s1390_s3, %s1396_s9  ;;  %p811_p8 = scmp.le.s32.totalorder %s103_s15, 0 }
  0x30   :  { %v955_v1 = vld [vmem:[#allocation9] sm:$0xff] (!%p811_p8)   ;;  %v956_v2 = vld [vmem:[#allocation9 + $0x8] sm:$0xff] (!%p811_p8)   ;;  %v957_v3 = vld [vmem:[#allocation9 + $0x10] sm:$0xff] (!%p811_p8)   ;;  %v1093_v17 = vmov (!%p811_p8), 66   ;;  %v1094_v18 = vmov (!%p811_p8), 67  }
  0x31   :  { %107 = sbr.rel (%p811_p8) target bundleno = 754 (0x2f2), region = 37  ;;  %865 = vmatprep.subr.bf16.mxu0 (!%p811_p8), %v955_v1  ;;  %v958_v4 = vld [vmem:[#allocation9 + $0x18] sm:$0xff] (!%p811_p8)   ;;  %v963_v5 = vld [vmem:[#allocation6] sm:$0xff] (!%p811_p8)   ;;  %v960_v7 = vld [vmem:[#allocation9 + $0x28] sm:$0xff] (!%p811_p8)   ;;  %932 = vset.pattern.permute.xlu0 (!%p811_p8), %v1093_v17 }
  0x32   :  { %866 = vmatpush3.bf16.msra.mxu0 (!%p811_p8), %v955_v1  ;;  %881 = vmatprep.mubr.bf16.mxu0 (!%p811_p8), %v963_v5  ;;  %v959_v6 = vld [vmem:[#allocation9 + $0x20] sm:$0xff] (!%p811_p8)   ;;  %v961_v8 = vld [vmem:[#allocation9 + $0x30] sm:$0xff] (!%p811_p8)   ;;  %v962_v9 = vld [vmem:[#allocation9 + $0x38] sm:$0xff] (!%p811_p8)  }
  0x33   :  { %867 = vmatprep.subr.bf16.mxu0 (!%p811_p8), %v956_v2  ;;  %v964_v10 = vld [vmem:[#allocation6 + $0x8] sm:$0xff] (!%p811_p8)   ;;  %v965_v11 = vld [vmem:[#allocation6 + $0x10] sm:$0xff] (!%p811_p8)   ;;  %v966_v12 = vld [vmem:[#allocation6 + $0x18] sm:$0xff] (!%p811_p8)   ;;  %935 = vset.pattern.permute.xlu1 (!%p811_p8), %v1094_v18 }
  0x34   :  { %v967_v13 = vld [vmem:[#allocation6 + $0x20] sm:$0xff] (!%p811_p8)   ;;  %v968_v14 = vld [vmem:[#allocation6 + $0x28] sm:$0xff] (!%p811_p8)   ;;  %v969_v15 = vld [vmem:[#allocation6 + $0x30] sm:$0xff] (!%p811_p8)  }
  0x35   :  { %v970_v16 = vld [vmem:[#allocation6 + $0x38] sm:$0xff] (!%p811_p8)  }
  0x36   :  { %868 = vmatpush3.bf16.msra.mxu0 (!%p811_p8), %v956_v2 }
  0x37   :  { %869 = vmatprep.subr.bf16.mxu0 (!%p811_p8), %v957_v3 }
  0x3a   :  { %870 = vmatpush3.bf16.msra.mxu0 %v957_v3 }
  0x3b   :  { %871 = vmatprep.subr.bf16.mxu0 %v958_v4 }
  0x3e   :  { %872 = vmatpush3.bf16.msra.mxu0 %v958_v4 }
  0x3f   :  { %873 = vmatprep.subr.bf16.mxu0 %v959_v6 }
  0x42   :  { %874 = vmatpush3.bf16.msra.mxu0 %v959_v6 }
  0x43   :  { %875 = vmatprep.subr.bf16.mxu0 %v960_v7 }
  0x46   :  { %876 = vmatpush3.bf16.msra.mxu0 %v960_v7 }
  0x47   :  { %877 = vmatprep.subr.bf16.mxu0 %v961_v8 }
  0x4a   :  { %878 = vmatpush3.bf16.msra.mxu0 %v961_v8 }
  0x4b   :  { %879 = vmatprep.subr.bf16.mxu0 %v962_v9 }
  0x4e   :  { %880 = vmatpush3.bf16.msra.mxu0 %v962_v9 }
  0x51   :  { %882 = vmatmul.mubr.bf16.vlgmr.msra.gmra.mrb[0].mxu0 %v964_v10 }
  0x52   :  { %885 = vmatprep.mubr.bf16.mxu0 %v965_v11 }
  0x59   :  { %886 = vmatmul.mubr.bf16.gmra.mrb[4].mxu0 %v966_v12 }
  0x5a   :  { %889 = vmatprep.mubr.bf16.mxu0 %v967_v13 }
  0x61   :  { %890 = vmatmul.mubr.bf16.gmra.mrb[8].mxu0 %v968_v14 }
  0x62   :  { %893 = vmatprep.mubr.bf16.mxu0 %v969_v15 }
  0x69   :  { %894 = vmatmul.mubr.bf16.gmra.mrb[12].mxu0 %v970_v16 }
 0x124   :  { %v1196_v19 = vpop.f32.mrb[0].mxu0 }
 0x125   :  { %vm335_vm0 = vcmp.gt.f32.partialorder %v1196_v19, 0.0  ;;  %v351_v20 = vmul.f32 0.2, %v1196_v19  ;;  %v1200_v21 = vpop.f32.mrb[1].mxu0 }
 0x126   :  { %vm333_vm1 = vcmp.gt.f32.partialorder %v1200_v21, 0.0  ;;  %v349_v22 = vmul.f32 0.2, %v1200_v21  ;;  %v1204_v23 = vpop.f32.mrb[2].mxu0 }
 0x127   :  { %v367_v24 = vsel %vm335_vm0, %v1196_v19, %v351_v20  ;;  %vm336_vm2 = vcmp.gt.f32.partialorder %v1204_v23, 0.0  ;;  %v352_v25 = vmul.f32 0.2, %v1204_v23  ;;  %v1209_v26 = vpop.f32.mrb[3].mxu0  ;;  %vm1096_vm0 = vmmov 0  }
 0x128   :  { %v383_v27 = vsub.f32 0.0, %v367_v24  ;;  %v365_v28 = vsel %vm333_vm1, %v1200_v21, %v349_v22  ;;  %v350_v34 = vmul.f32 0.2, %v1209_v26  ;;  %vm334_vm3 = vcmp.gt.f32.partialorder %v1209_v26, 0.0 }
 0x129   :  { %v381_v29 = vsub.f32 0.0, %v365_v28  ;;  %v368_v30 = vsel %vm336_vm2, %v1204_v23, %v352_v25  ;;  %v1095_v24 = vmov 0.0  }
 0x12a   :  { %v401_v31 = vmul.f32 1.442695, %v383_v27  ;;  %v384_v32 = vsub.f32 0.0, %v368_v30  ;;  %v366_v40 = vsel %vm334_vm3, %v1209_v26, %v350_v34  ;;  %897 = vmatprep.subr.bf16.mxu1 %v1095_v24  ;;  %913 = vmatprep.mubr.msk.bf16.mxu1 %vm1096_vm0, %v1095_v24 }
 0x12b   :  { %v397_v33 = vmul.f32 1.442695, %v381_v29  ;;  %v382_v44 = vsub.f32 0.0, %v366_v40 }
 0x12c   :  { %971 = vpow2.f32 %v401_v31  ;;  %v1215_v35 = vpop.f32.mrb[4].mxu0  ;;  %v403_v38 = vmul.f32 1.442695, %v384_v32 }
 0x12d   :  { %973 = vpow2.f32 %v397_v33  ;;  %v355_v36 = vmul.f32 0.2, %v1215_v35  ;;  %v1218_v37 = vpop.f32.mrb[5].mxu0  ;;  %vm339_vm4 = vcmp.gt.f32.partialorder %v1215_v35, 0.0  ;;  %v399_v50 = vmul.f32 1.442695, %v382_v44 }
 0x12e   :  { %v1221_v39 = vpop.f32.mrb[6].mxu0  ;;  %v353_v43 = vmul.f32 0.2, %v1218_v37  ;;  %975 = vpow2.f32 %v403_v38  ;;  %vm337_vm5 = vcmp.gt.f32.partialorder %v1218_v37, 0.0 }
 0x12f   :  { %v1224_v41 = vpop.f32.mrb[7].mxu0  ;;  %v371_v42 = vsel %vm339_vm4, %v1215_v35, %v355_v36  ;;  %977 = vpow2.f32 %v399_v50  ;;  %v356_v57 = vmul.f32 0.2, %v1221_v39  ;;  %vm340_vm7 = vcmp.gt.f32.partialorder %v1221_v39, 0.0 }
 0x130   :  { %v387_v45 = vsub.f32 0.0, %v371_v42  ;;  %v369_v47 = vsel %vm337_vm5, %v1218_v37, %v353_v43  ;;  %v354_v56 = vmul.f32 0.2, %v1224_v41  ;;  %vm338_vm6 = vcmp.gt.f32.partialorder %v1224_v41, 0.0 }
 0x131   :  { %v385_v55 = vsub.f32 0.0, %v369_v47  ;;  %v372_v0 = vsel %vm340_vm7, %v1221_v39, %v356_v57 }
 0x132   :  { %v409_v54 = vmul.f32 1.442695, %v387_v45  ;;  %v370_v62 = vsel %vm338_vm6, %v1224_v41, %v354_v56  ;;  %v388_v5 = vsub.f32 0.0, %v372_v0 }
 0x133   :  { %v405_v60 = vmul.f32 1.442695, %v385_v55  ;;  %v386_v4 = vsub.f32 0.0, %v370_v62 }
 0x134   :  { %v1229_v46 = vpop.f32.mrb[8].mxu0  ;;  %979 = vpow2.f32 %v409_v54  ;;  %v411_v9 = vmul.f32 1.442695, %v388_v5 }
 0x135   :  { %v1232_v48 = vpop.f32.mrb[9].mxu0  ;;  %v359_v58 = vmul.f32 0.2, %v1229_v46  ;;  %vm343_vm8 = vcmp.gt.f32.partialorder %v1229_v46, 0.0  ;;  %981 = vpow2.f32 %v405_v60  ;;  %v407_v8 = vmul.f32 1.442695, %v386_v4 }
 0x136   :  { %v972_v49 = vpop.eup %971  ;;  %v1234_v51 = vpop.f32.mrb[10].mxu0  ;;  %v357_v13 = vmul.f32 0.2, %v1232_v48  ;;  %vm341_vm10 = vcmp.gt.f32.partialorder %v1232_v48, 0.0 }
 0x137   :  { %v974_v52 = vpop.eup %973  ;;  %442 = vperm.xlu0 %932, %v972_v49   ;;  %v1236_v53 = vpop.f32.mrb[11].mxu0  ;;  %v375_v2 = vsel %vm343_vm8, %v1229_v46, %v359_v58  ;;  %983 = vpow2.f32 %v407_v8  ;;  %v360_v36 = vmul.f32 0.2, %v1234_v51  ;;  %vm344_vm13 = vcmp.gt.f32.partialorder %v1234_v51, 0.0 }
 0x138   :  { %532 = vperm.xlu1 %935, %v974_v52   ;;  %v976_v59 = vpop.eup %975  ;;  %v391_v6 = vsub.f32 0.0, %v375_v2  ;;  %v358_v10 = vmul.f32 0.2, %v1236_v53  ;;  %vm342_vm9 = vcmp.gt.f32.partialorder %v1236_v53, 0.0  ;;  %985 = vpow2.f32 %v411_v9 }
 0x139   :  { %v978_v7 = vpop.eup %977  ;;  %v373_v20 = vsel %vm341_vm10, %v1232_v48, %v357_v13  ;;  %v376_v43 = vsel %vm344_vm13, %v1234_v51, %v360_v36 }
 0x13a   :  { %v417_v12 = vmul.f32 1.442695, %v391_v6  ;;  %v374_v14 = vsel %vm342_vm9, %v1236_v53, %v358_v10  ;;  %v389_v28 = vsub.f32 0.0, %v373_v20  ;;  %v392_v45 = vsub.f32 0.0, %v376_v43  ;;  %v1302_v10 = vld [vmem:[%s1392_s5] ss:$0 sm:$0xff] }
 0x13b   :  { %933 = vset.pattern.permute.xlu0 %v1094_v18  ;;  %v390_v22 = vsub.f32 0.0, %v374_v14 }
 0x13c   :  { %540 = vperm.xlu0 %933, %v972_v49   ;;  %936 = vset.pattern.permute.xlu1 %v1093_v17  ;;  %v1246_v61 = vpop.f32.mrb[12].mxu0  ;;  %987 = vpow2.f32 %v417_v12  ;;  %v413_v34 = vmul.f32 1.442695, %v389_v28  ;;  %v419_v49 = vmul.f32 1.442695, %v392_v45 }
 0x13d   :  { %447 = vperm.xlu1 %936, %v976_v59   ;;  %v1249_v63 = vpop.f32.mrb[13].mxu0  ;;  %v363_v15 = vmul.f32 0.2, %v1246_v61  ;;  %vm347_vm11 = vcmp.gt.f32.partialorder %v1246_v61, 0.0  ;;  %v415_v29 = vmul.f32 1.442695, %v390_v22 }
 0x13e   :  { %v1252_v1 = vpop.f32.mrb[14].mxu0  ;;  %v980_v11 = vpop.eup %979  ;;  %vm345_vm14 = vcmp.gt.f32.partialorder %v1249_v63, 0.0 }
 0x13f   :  { %v1255_v3 = vpop.f32.mrb[15].mxu0  ;;  %v982_v16 = vpop.eup %981  ;;  %v379_v25 = vsel %vm347_vm11, %v1246_v61, %v363_v15  ;;  %989 = vpow2.f32 %v415_v29  ;;  %v364_v58 = vmul.f32 0.2, %v1252_v1  ;;  %vm348_vm15 = vcmp.gt.f32.partialorder %v1252_v1, 0.0 }
 0x140   :  { %934 = vset.pattern.permute.xlu0 %v1093_v17  ;;  %v362_v27 = vmul.f32 0.2, %v1255_v3  ;;  %vm346_vm12 = vcmp.gt.f32.partialorder %v1255_v3, 0.0  ;;  %v395_v30 = vsub.f32 0.0, %v379_v25  ;;  %991 = vpow2.f32 %v413_v34 }
 0x141   :  { %432 = vperm.xlu0 %934, %v974_v52   ;;  %937 = vset.pattern.permute.xlu1 %v1094_v18  ;;  %v984_v32 = vpop.eup %983  ;;  %v361_v52 = vmul.f32 0.2, %v1249_v63  ;;  %v380_v62 = vsel %vm348_vm15, %v1252_v1, %v364_v58 }
 0x142   :  { %544 = vperm.xlu1 %937, %v976_v59   ;;  %v378_v31 = vsel %vm346_vm12, %v1255_v3, %v362_v27  ;;  %v986_v33 = vpop.eup %985  ;;  %v425_v40 = vmul.f32 1.442695, %v395_v30  ;;  %v396_v0 = vsub.f32 0.0, %v380_v62 }
 0x143   :  { %v394_v42 = vsub.f32 0.0, %v378_v31  ;;  %v377_v55 = vsel %vm345_vm14, %v1249_v63, %v361_v52 }
 0x144   :  { %993 = vpow2.f32 %v425_v40  ;;  %v393_v57 = vsub.f32 0.0, %v377_v55  ;;  %v427_v2 = vmul.f32 1.442695, %v396_v0 }
 0x145   :  { %437 = vperm.xlu0 %934, %v978_v7   ;;  %v423_v44 = vmul.f32 1.442695, %v394_v42 }
 0x146   :  { %536 = vperm.xlu1 %937, %v978_v7   ;;  %v988_v38 = vpop.eup %987  ;;  %v421_v60 = vmul.f32 1.442695, %v393_v57 }
 0x147   :  { %995 = vpow2.f32 %v423_v44 }
 0x148   :  { %997 = vpow2.f32 %v419_v49 }
 0x149   :  { %462 = vperm.xlu0 %934, %v980_v11   ;;  %v990_v47 = vpop.eup %989  ;;  %999 = vpow2.f32 %v421_v60 }
 0x14a   :  { %939 = vset.pattern.permute.xlu1 %v1093_v17  ;;  %v992_v50 = vpop.eup %991  ;;  %1001 = vpow2.f32 %v427_v2 }
 0x14b   :  { %452 = vperm.xlu1 %939, %v982_v16  }
 0x14d   :  { %938 = vset.pattern.permute.xlu0 %v1094_v18 }
 0x14e   :  { %556 = vperm.xlu0 %938, %v980_v11   ;;  %v994_v54 = vpop.eup %993 }
 0x14f   :  { %940 = vset.pattern.permute.xlu1 %v1094_v18 }
 0x150   :  { %548 = vperm.xlu1 %940, %v982_v16  }
 0x151   :  { %v996_v56 = vpop.eup %995 }
 0x152   :  { %943 = vset.pattern.permute.xlu0 %v1093_v17  ;;  %v998_v59 = vpop.eup %997 }
 0x153   :  { %457 = vperm.xlu0 %943, %v984_v32   ;;  %v1000_v4 = vpop.eup %999 }
 0x154   :  { %941 = vset.pattern.permute.xlu1 %v1093_v17  ;;  %v1002_v5 = vpop.eup %1001 }
 0x155   :  { %467 = vperm.xlu1 %941, %v986_v33  }
 0x157   :  { %482 = vperm.xlu0 %943, %v988_v38  }
 0x159   :  { %942 = vset.pattern.permute.xlu1 %v1094_v18 }
 0x15a   :  { %560 = vperm.xlu1 %942, %v986_v33  }
 0x15b   :  { %944 = vset.pattern.permute.xlu0 %v1094_v18 }
 0x15c   :  { %572 = vperm.xlu0 %944, %v988_v38  }
 0x15e   :  { %552 = vperm.xlu1 %942, %v984_v32  }
 0x160   :  { %949 = vset.pattern.permute.xlu0 %v1093_v17 }
 0x161   :  { %477 = vperm.xlu0 %949, %v990_v47  }
 0x162   :  { %945 = vset.pattern.permute.xlu1 %v1093_v17 }
 0x163   :  { %472 = vperm.xlu1 %945, %v992_v50  }
 0x165   :  { %502 = vperm.xlu0 %949, %v994_v54  }
 0x167   :  { %946 = vset.pattern.permute.xlu1 %v1094_v18 }
 0x168   :  { %564 = vperm.xlu1 %946, %v992_v50  }
 0x169   :  { %497 = vperm.xlu0 %949, %v996_v56  }
 0x16c   :  { %947 = vset.pattern.permute.xlu1 %v1093_v17 }
 0x16d   :  { %487 = vperm.xlu1 %947, %v998_v59   ;;  %954 = vset.pattern.permute.xlu0 %v1094_v18 }
 0x16e   :  { %588 = vperm.xlu0 %954, %v994_v54  }
 0x171   :  { %948 = vset.pattern.permute.xlu1 %v1094_v18 }
 0x172   :  { %576 = vperm.xlu1 %948, %v998_v59  }
 0x176   :  { %568 = vperm.xlu1 %948, %v990_v47  }
 0x17a   :  { %950 = vset.pattern.permute.xlu1 %v1093_v17 }
 0x17b   :  { %492 = vperm.xlu1 %950, %v1000_v4  }
 0x17f   :  { %951 = vset.pattern.permute.xlu1 %v1094_v18 }
 0x180   :  { %580 = vperm.xlu1 %951, %v1000_v4  }
 0x184   :  { %952 = vset.pattern.permute.xlu1 %v1093_v17  ;;  %v1307_v17 = vld [vmem:[%s1392_s5 + $0x1] ss:$0 sm:$0xff] }
 0x185   :  { %507 = vperm.xlu1 %952, %v1002_v5  }
 0x189   :  { %953 = vset.pattern.permute.xlu1 %v1094_v18 }
 0x18a   :  { %584 = vperm.xlu1 %953, %v996_v56  }
 0x18e   :  { %592 = vperm.xlu1 %953, %v1002_v5  }
 0x1b6   :  { %v443_v6 = vpop.permute.xlu0 %442 }
 0x1b7   :  { %v533_v7 = vpop.permute.xlu1 %532  ;;  %v516_v11 = vmul.f32 %v1302_v10, %v443_v6 }
 0x1b8   :  { %v599_v22 = vmul.f32 %v1307_v17, %v533_v7 }
 0x1bb   :  { %v541_v8 = vpop.permute.xlu0 %540 }
 0x1bc   :  { %v448_v9 = vpop.permute.xlu1 %447  ;;  %v601_v18 = vmul.f32 %v1307_v17, %v541_v8 }
 0x1bd   :  { %v517_v15 = vmul.f32 %v1302_v10, %v448_v9 }
 0x1be   :  { %v617_v14 = vadd.f32 %v601_v18, %v516_v11 }
 0x1c0   :  { %v433_v12 = vpop.permute.xlu0 %432  ;;  %v633_v30 = vmul.f32 %v1196_v19, %v617_v14 }
 0x1c1   :  { %v545_v13 = vpop.permute.xlu1 %544  ;;  %v514_v16 = vmul.f32 %v1302_v10, %v433_v12 }
 0x1c2   :  { %v602_v20 = vmul.f32 %v1307_v17, %v545_v13 }
 0x1c3   :  { %v615_v31 = vadd.f32 %v599_v22, %v514_v16 }
 0x1c4   :  { %v618_v25 = vadd.f32 %v602_v20, %v517_v15  ;;  %v438_v27 = vpop.permute.xlu0 %437 }
 0x1c5   :  { %v515_v28 = vmul.f32 %v1302_v10, %v438_v27  ;;  %v537_v29 = vpop.permute.xlu1 %536  ;;  %v631_v40 = vmul.f32 %v615_v31, %v1200_v21 }
 0x1c6   :  { %v634_v32 = vmul.f32 %v1204_v23, %v618_v25  ;;  %v600_v33 = vmul.f32 %v1307_v17, %v537_v29 }
 0x1c8   :  { %v616_v34 = vadd.f32 %v600_v33, %v515_v28  ;;  %v648_v36 = vpack.c.bf16 %v634_v32, %v633_v30  ;;  %v463_v43 = vpop.permute.xlu0 %462 }
 0x1c9   :  { %v520_v49 = vmul.f32 %v1302_v10, %v463_v43 }
 0x1ca   :  { %v453_v38 = vpop.permute.xlu1 %452  ;;  %v632_v42 = vmul.f32 %v616_v34, %v1209_v26 }
 0x1cb   :  { %v518_v56 = vmul.f32 %v1302_v10, %v453_v38 }
 0x1cc   :  { %v647_v44 = vpack.c.bf16 %v632_v42, %v631_v40 }
 0x1cd   :  { %v557_v47 = vpop.permute.xlu0 %556 }
 0x1ce   :  { %898 = vmatpush3.bf16.msra.mxu1 %v647_v44  ;;  %v605_v23 = vmul.f32 %v1307_v17, %v557_v47 }
 0x1cf   :  { %v549_v45 = vpop.permute.xlu1 %548  ;;  %899 = vmatprep.subr.bf16.mxu1 %v1095_v24 }
 0x1d0   :  { %v621_v50 = vadd.f32 %v605_v23, %v520_v49  ;;  %v603_v21 = vmul.f32 %v1307_v17, %v549_v45 }
 0x1d2   :  { %900 = vmatpush3.bf16.msra.mxu1 %v648_v36  ;;  %v458_v55 = vpop.permute.xlu0 %457  ;;  %v637_v58 = vmul.f32 %v1215_v35, %v621_v50  ;;  %v619_v60 = vadd.f32 %v603_v21, %v518_v56 }
 0x1d3   :  { %901 = vmatprep.subr.bf16.mxu1 %v1095_v24  ;;  %v519_v62 = vmul.f32 %v1302_v10, %v458_v55 }
 0x1d4   :  { %v468_v19 = vpop.permute.xlu1 %467  ;;  %v635_v6 = vmul.f32 %v619_v60, %v1218_v37 }
 0x1d5   :  { %v521_v26 = vmul.f32 %v1302_v10, %v468_v19  ;;  %v655_v19 = vlaneseq }
 0x1d6   :  { %v483_v9 = vpop.permute.xlu0 %482 }
 0x1d7   :  { %v524_v12 = vmul.f32 %v1302_v10, %v483_v9 }
 0x1d9   :  { %v561_v52 = vpop.permute.xlu1 %560 }
 0x1da   :  { %v606_v54 = vmul.f32 %v1307_v17, %v561_v52 }
 0x1db   :  { %v573_v35 = vpop.permute.xlu0 %572 }
 0x1dc   :  { %v622_v57 = vadd.f32 %v606_v54, %v521_v26  ;;  %v609_v13 = vmul.f32 %v1307_v17, %v573_v35  ;;  %v656_v26 = vshrl.u32 %v655_v19, 7 }
 0x1dd   :  { %v553_v59 = vpop.permute.xlu1 %552 }
 0x1de   :  { %v638_v0 = vmul.f32 %v1221_v39, %v622_v57  ;;  %v604_v2 = vmul.f32 %v1307_v17, %v553_v59  ;;  %v625_v14 = vadd.f32 %v609_v13, %v524_v12 }
 0x1e0   :  { %v620_v4 = vadd.f32 %v604_v2, %v519_v62  ;;  %v650_v5 = vpack.c.bf16 %v638_v0, %v637_v58  ;;  %v478_v20 = vpop.permute.xlu0 %477  ;;  %v641_v27 = vmul.f32 %v1229_v46, %v625_v14  ;;  %v657_v62 = vadd.s32 8, %v656_v26 }
 0x1e1   :  { %v523_v29 = vmul.f32 %v1302_v10, %v478_v20 }
 0x1e2   :  { %v636_v7 = vmul.f32 %v620_v4, %v1224_v41  ;;  %v473_v8 = vpop.permute.xlu1 %472  ;;  %v830_v4 = vld [vmem:[%s89_s20] ss:$0 sm:$0xff] }
 0x1e3   :  { %v522_v22 = vmul.f32 %v1302_v10, %v473_v8  ;;  %vm667_vm1 = vcmp.eq.s32.totalorder %v656_v26, %v830_v4  ;;  %vm668_vm2 = vcmp.eq.s32.totalorder %v657_v62, %v830_v4 }
 0x1e4   :  { %v649_v18 = vpack.c.bf16 %v636_v7, %v635_v6  ;;  %v503_v36 = vpop.permute.xlu0 %502  ;;  %vm833_vm3 = vmpackc.low %vm668_vm2, %vm667_vm1  ;;  %v675_v7 = vld [vmem:[#allocation2 + $0x8] sm:$0xff] }
 0x1e6   :  { %902 = vmatpush3.bf16.msra.mxu1 %v649_v18 }
 0x1e7   :  { %v565_v11 = vpop.permute.xlu1 %564  ;;  %903 = vmatprep.subr.bf16.mxu1 %v1095_v24 }
 0x1e8   :  { %v607_v41 = vmul.f32 %v1307_v17, %v565_v11  ;;  %v498_v46 = vpop.permute.xlu0 %497 }
 0x1e9   :  { %v527_v50 = vmul.f32 %v1302_v10, %v498_v46 }
 0x1ea   :  { %904 = vmatpush3.bf16.msra.mxu1 %v650_v5  ;;  %v623_v30 = vadd.f32 %v607_v41, %v522_v22 }
 0x1eb   :  { %905 = vmatprep.subr.bf16.mxu1 %v1095_v24 }
 0x1ec   :  { %v488_v39 = vpop.permute.xlu1 %487  ;;  %v639_v38 = vmul.f32 %v623_v30, %v1232_v48  ;;  %v528_v48 = vmul.f32 %v1302_v10, %v503_v36 }
 0x1ed   :  { %v525_v15 = vmul.f32 %v1302_v10, %v488_v39  ;;  %v589_v45 = vpop.permute.xlu0 %588 }
 0x1f1   :  { %v577_v37 = vpop.permute.xlu1 %576 }
 0x1f2   :  { %v610_v16 = vmul.f32 %v1307_v17, %v577_v37 }
 0x1f4   :  { %v626_v25 = vadd.f32 %v610_v16, %v525_v15 }
 0x1f5   :  { %v569_v28 = vpop.permute.xlu1 %568 }
 0x1f6   :  { %v642_v31 = vmul.f32 %v1234_v51, %v626_v25  ;;  %v608_v32 = vmul.f32 %v1307_v17, %v569_v28 }
 0x1f8   :  { %v624_v33 = vadd.f32 %v608_v32, %v523_v29  ;;  %v652_v34 = vpack.c.bf16 %v642_v31, %v641_v27 }
 0x1fa   :  { %v640_v40 = vmul.f32 %v624_v33, %v1236_v53  ;;  %v493_v42 = vpop.permute.xlu1 %492  ;;  %v613_v53 = vmul.f32 %v1307_v17, %v589_v45 }
 0x1fb   :  { %v526_v23 = vmul.f32 %v1302_v10, %v493_v42 }
 0x1fc   :  { %v651_v43 = vpack.c.bf16 %v640_v40, %v639_v38  ;;  %v629_v55 = vadd.f32 %v613_v53, %v528_v48 }
 0x1fe   :  { %906 = vmatpush3.bf16.msra.mxu1 %v651_v43  ;;  %v645_v5 = vmul.f32 %v1246_v61, %v629_v55 }
 0x1ff   :  { %v581_v44 = vpop.permute.xlu1 %580  ;;  %907 = vmatprep.subr.bf16.mxu1 %v1095_v24 }
 0x200   :  { %v611_v47 = vmul.f32 %v1307_v17, %v581_v44 }
 0x202   :  { %908 = vmatpush3.bf16.msra.mxu1 %v652_v34  ;;  %v627_v52 = vadd.f32 %v611_v47, %v526_v23 }
 0x203   :  { %909 = vmatprep.subr.bf16.mxu1 %v1095_v24 }
 0x204   :  { %v508_v51 = vpop.permute.xlu1 %507  ;;  %v643_v57 = vmul.f32 %v627_v52, %v1249_v63 }
 0x205   :  { %v529_v58 = vmul.f32 %v1302_v10, %v508_v51  ;;  %v674_v10 = vld [vmem:[#allocation2] sm:$0xff] }
 0x209   :  { %v585_v49 = vpop.permute.xlu1 %584 }
 0x20a   :  { %v612_v21 = vmul.f32 %v1307_v17, %v585_v49 }
 0x20c   :  { %v628_v54 = vadd.f32 %v612_v21, %v527_v50 }
 0x20d   :  { %v593_v56 = vpop.permute.xlu1 %592 }
 0x20e   :  { %v644_v59 = vmul.f32 %v628_v54, %v1255_v3  ;;  %v614_v60 = vmul.f32 %v1307_v17, %v593_v56  ;;  %v1097_v3 = vmov 1.0|1.0  }
 0x210   :  { %v630_v0 = vadd.f32 %v614_v60, %v529_v58  ;;  %v653_v2 = vpack.c.bf16 %v644_v59, %v643_v57 }
 0x212   :  { %v646_v6 = vmul.f32 %v1252_v1, %v630_v0  ;;  %910 = vmatpush3.bf16.msra.mxu1 %v653_v2 }
 0x213   :  { %911 = vmatprep.subr.bf16.mxu1 %v1095_v24 }
 0x214   :  { %v654_v63 = vpack.c.bf16 %v646_v6, %v645_v5 }
 0x216   :  { %912 = vmatpush3.bf16.msra.mxu1 %v654_v63 }
 0x219   :  { %914 = vmatmul.mubr.msk.bf16.vlgmr.msra.gmra.mrb[0].mxu1 %vm833_vm3, %v1097_v3 }
 0x2ec   :  { %v710_v17 = vpop.f32.mrb[0].mxu1 }
 0x2ed   :  { %v717_v8 = vadd.f32 %v710_v17, %v674_v10  ;;  %v915_v9 = vpop.f32.mrb[1].mxu1 }
 0x2ee   :  { %v713_v18 = vpop.f32.mrb[2].mxu1 }
 0x2ef   :  { %719 = vst [vmem:[#allocation2] sm:$0xff] %v717_v8  ;;  %v718_v61 = vadd.f32 %v713_v18, %v675_v7  ;;  %v916_v11 = vpop.f32.mrb[3].mxu1 }
 0x2f1   :  { %720 = vst [vmem:[#allocation2 + $0x8] sm:$0xff] %v718_v61 }
 0x2f2 PF:  { %v1098_v35 = vmov 65   ;;  %v1099_v39 = vmov 64   ;;  %v836_v41 = vld [vmem:[%s1393_s6 + $0x1] ss:$0 sm:$0xff]  ;;  %v835_v15 = vld [vmem:[%s1393_s6] ss:$0 sm:$0xff] }
 0x2f3   :  { %1004 = vset.pattern.permute.xlu1 %v1098_v35  ;;  %1003 = vset.pattern.permute.xlu0 %v1099_v39  ;;  %s1100_s6 = smov [#allocation11]  }
 0x2f4   :  { %s787_s26 = sshll.u32 %s1100_s6, 4  ;;  %s788_s26 = int_to_ptr.vmem [resolvable:$true] %s787_s26 }
 0x2f5   :  { %s1060_s2 = scalar_lea.vmem %s788_s26, 256  ;;  %p1065_p9 = scmp.lt.s32.totalorder %s788_s26, %s788_s26 }
 0x2f6   :  { %v724_v1 = vld [vmem:[#allocation2] sm:$0xff]  ;;  %p1061_p0 = scmp.ne.s32.totalorder %s788_s26, %s1060_s2  ;;  %p1066_p10 = scmp.lt.s32.totalorder %s1060_s2, %s1060_s2 }
 0x2f7   :  { %vm726_vm4 = vcmp.eq.f32.partialorder %v724_v1, 0.0 }
 0x2f8   :  { %v725_v24 = vld [vmem:[#allocation2 + $0x8] sm:$0xff]  ;;  %v728_v12 = vsel %vm726_vm4, 1e-12, %v724_v1  ;;  %p1067_p11 = por %p1066_p10, %p1065_p9 }
 0x2f9   :  { %vm727_vm5 = vcmp.eq.f32.partialorder %v725_v24, 0.0  ;;  %1006 = vrcp.f32 %v728_v12 }
 0x2fa   :  { %v729_v13 = vsel %vm727_vm5, 1e-12, %v725_v24  ;;  %p1068_p12 = pnand %p1067_p11, %p1061_p0 }
 0x2fb   :  { %1008 = vrcp.f32 %v729_v13 }
 0x303   :  { %v1007_v14 = vpop.eup %1006 }
 0x304   :  { %753 = vperm.xlu1 %1004, %v1007_v14   ;;  %737 = vperm.xlu0 %1003, %v1007_v14  }
 0x305   :  { %v1009_v37 = vpop.eup %1008 }
 0x308   :  { %757 = vperm.xlu1 %1004, %v1009_v37   ;;  %742 = vperm.xlu0 %1003, %v1009_v37  }
 0x30c   :  { %1005 = vset.pattern.permute.xlu0 %v1098_v35 }
 0x383   :  { %v754_v16 = vpop.permute.xlu1 %753  ;;  %v738_v20 = vpop.permute.xlu0 %737 }
 0x384   :  { %v764_v22 = vmul.f32 %v836_v41, %v754_v16  ;;  %v749_v25 = vmul.f32 %v835_v15, %v738_v20 }
 0x386   :  { %v766_v27 = vadd.f32 %v764_v22, %v749_v25 }
 0x387   :  { %v758_v28 = vpop.permute.xlu1 %757  ;;  %v743_v29 = vpop.permute.xlu0 %742 }
 0x388   :  { %v768_v30 = vmul.f32 %v766_v27, %v724_v1  ;;  %v765_v31 = vmul.f32 %v836_v41, %v758_v28  ;;  %v750_v32 = vmul.f32 %v835_v15, %v743_v29 }
 0x38a   :  { %v772_v33 = vmul.f32 1.442695, %v768_v30  ;;  %v767_v34 = vadd.f32 %v765_v31, %v750_v32  ;;  %vm770_vm6 = vcmp.gt.f32.partialorder %v768_v30, 0.0 }
 0x38c   :  { %1010 = vpow2.f32 %v772_v33  ;;  %v769_v36 = vmul.f32 %v767_v34, %v725_v24 }
 0x38e   :  { %v774_v38 = vmul.f32 1.442695, %v769_v36  ;;  %vm771_vm7 = vcmp.gt.f32.partialorder %v769_v36, 0.0 }
 0x390   :  { %1012 = vpow2.f32 %v774_v38 }
 0x396   :  { %v1011_v40 = vpop.eup %1010 }
 0x397   :  { %v837_v42 = vadd.f32 -1.0, %v1011_v40 }
 0x399   :  { %v778_v43 = vsel %vm770_vm6, %v768_v30, %v837_v42 }
 0x39a   :  { %v1013_v44 = vpop.eup %1012  ;;  %780 = vst [vmem:[#allocation11] sm:$0xff] %v778_v43 }
 0x39b   :  { %v838_v46 = vadd.f32 -1.0, %v1013_v44 }
 0x39d   :  { %v779_v51 = vsel %vm771_vm7, %v769_v36, %v838_v46 }
 0x39e   :  { %781 = vst [vmem:[#allocation11 + $0x8] sm:$0xff] %v779_v51 }
 0x39f   :  { %1071 = shalt.err (!%p1068_p12)
}
 0x3a0   :  { %s1072_s30 = scalar_lea.hbm %s1394_s7, 256 }
 0x3a1   :  { %p1073_p13 = scmp.ne.s32.totalorder %s1394_s7, %s1072_s30  ;;  %p1076_p1 = scmp.lt.u32.totalorder %s1072_s30, %s1394_s7 }
 0x3a3   :  { %p1078_p2 = pnand %p1076_p1, %p1073_p13 }
 0x3a5   :  { %1081 = shalt.err (!%p1078_p2)
}
 0x3a6   :  { %s1101_s12 = smov 128   ;;  %s1102_s13 = smov 8  }
 0x3a7   :  { %793 = dma.vmem_to_hbm [thread:$0]  %s788_s26, 256, %s1394_s7, [#allocation8], %s1101_s12, %s1101_s12, %s1102_s13  }
 0x3a8   :  { %1086 = dma.done.wait [#allocation8], 256  }
 0x3a9   :  { %1087 = vsyncadd [#allocation8], 4294967040 }
 0x3aa   :  { %797 = vsyncpa [#allocation7], 1 }
 0x3ab   :  { %798 = vsyncpa [#allocation10], 1 }
 0x3ac   :  { %799 = vsyncpa [#allocation8], 1 }

</bundles_post_ra>
